<compile_context>
chip_gen: v5e
topology: v5e:2x2
jax: 0.10.0
libtpu: 0.0.40
codegen_flags: <defaults>
</compile_context>

<pallas_src>
import functools

import jax
import jax.numpy as jnp
from jax import lax
from jax.experimental import pallas as pl
from jax.experimental.pallas import tpu as pltpu


# --------------------------------------------------------------------------- #
# Shared epilogue: tanh( fc2(relu(fc1(avg))) + fc2(relu(fc1(max))) ).
# fc2 is linear, so run one fc1 matmul on the stacked rows and one fc2 matmul
# on the summed post-relu hiddens.
# --------------------------------------------------------------------------- #
def _se_mlp(avg, mx, w1t, w2t):
    m = avg.shape[0]
    stacked = jnp.concatenate([avg, mx], axis=0)                       # (2m, C)
    h = jnp.maximum(jnp.dot(stacked, w1t,
                            preferred_element_type=jnp.float32), 0.0)  # (2m, Cr)
    h = h[:m] + h[m:]                                                  # (m, Cr)
    out = jnp.dot(h, w2t, preferred_element_type=jnp.float32)          # (m, C)
    return jnp.tanh(out)


# --------------------------------------------------------------------------- #
# Regime 1: whole (bt, C, HW) slab in one grid step (typical SE feature maps).
# --------------------------------------------------------------------------- #
def _ca_fused_kernel(x_ref, w1t_ref, w2t_ref, o_ref, *, hw_total):
    x = x_ref[...].astype(jnp.float32)                     # (bt, C, HW)
    avg = jnp.sum(x, axis=-1) * (1.0 / hw_total)           # (bt, C)
    mx = jnp.max(x, axis=-1)                               # (bt, C)
    out = _se_mlp(avg, mx,
                  w1t_ref[...].astype(jnp.float32),
                  w2t_ref[...].astype(jnp.float32))
    o_ref[...] = out[:, None, :].astype(o_ref.dtype)       # (bt, 1, C)


# --------------------------------------------------------------------------- #
# Regime 2: large HW — stream (1, C, hw_tile) blocks, lane-resident accumulators.
# --------------------------------------------------------------------------- #
def _ca_streaming_kernel(x_ref, w1t_ref, w2t_ref, o_ref, sum_acc, max_acc,
                         *, hw_total, hw_tile, needs_mask):
    # x_ref   : (1, C, hw_tile)   current spatial tile of one batch element
    # sum_acc : (1, C, 128) f32   lane-resident running sum
    # max_acc : (1, C, 128) x.dt  lane-resident running max (native dtype)
    k = pl.program_id(1)
    n_k = pl.num_programs(1)
    nchunks = hw_tile // 128        # hw_tile is a multiple of 128 in this regime

    @pl.when(k == 0)
    def _init():
        sum_acc[...] = jnp.zeros_like(sum_acc)
        max_acc[...] = jnp.full_like(max_acc, -jnp.inf)

    def _accumulate(masked):
        def body(j, carry):
            s, m = carry
            off = pl.multiple_of(j * 128, 128)
            c = x_ref[:, :, pl.ds(off, 128)]               # (1, C, 128), native dtype
            if masked:
                lane = (jax.lax.broadcasted_iota(jnp.int32, c.shape, 2)
                        + off + k * hw_tile)
                valid = lane < hw_total
                s = s + jnp.where(valid, c.astype(jnp.float32), 0.0)
                m = jnp.maximum(m, jnp.where(valid, c,
                                             jnp.asarray(-jnp.inf, dtype=c.dtype)))
            else:
                s = s + c.astype(jnp.float32)
                m = jnp.maximum(m, c)
            return s, m

        s, m = lax.fori_loop(0, nchunks, body,
                             (sum_acc[...], max_acc[...]),
                             unroll=min(8, nchunks))
        sum_acc[...] = s
        max_acc[...] = m

    if needs_mask:
        @pl.when(k < n_k - 1)
        def _hot():                      # hot loop: no mask work
            _accumulate(masked=False)

        @pl.when(k == n_k - 1)
        def _last():                     # only the last spatial tile is masked
            _accumulate(masked=True)
    else:
        _accumulate(masked=False)

    @pl.when(k == n_k - 1)
    def _finalize():
        # Single cross-lane (XLU) collapse per batch element, then the tiny MLP.
        avg = jnp.sum(sum_acc[...], axis=-1) * (1.0 / hw_total)        # (1, C)
        mx = jnp.max(max_acc[...].astype(jnp.float32), axis=-1)        # (1, C)
        out = _se_mlp(avg, mx,
                      w1t_ref[...].astype(jnp.float32),
                      w2t_ref[...].astype(jnp.float32))
        o_ref[...] = out[:, None, :].astype(o_ref.dtype)               # (1, 1, C)


# --------------------------------------------------------------------------- #
# Wrapper
# --------------------------------------------------------------------------- #
def _vmem_capacity_bytes():
    try:
        return int(pltpu.get_tpu_info().vmem_capacity_bytes)
    except Exception:
        return 64 * 1024 * 1024          # conservative fallback (v7x-sized)


def channel_attention(x, w1, w2, *, max_tile_bytes=None):
    """x: (B, C, H, W); w1: (Cr, C) [fc1 1x1]; w2: (C, Cr) [fc2 1x1].
    Returns (B, C, 1, 1), matching the PyTorch module output.
    `max_tile_bytes` is a test/override hook for the per-step tile size."""
    B, C, H, W = x.shape
    Cr = w1.shape[0]
    HW = H * W
    itemsize = x.dtype.itemsize

    x_flat = x.reshape(B, C, HW)
    w1t = jnp.transpose(w1)              # (C, Cr) — transpose in wrapper
    w2t = jnp.transpose(w2)              # (Cr, C)

    # Generation-aware sizing: ~8 MiB per x tile on v5e/v6e (128 MiB VMEM),
    # ~5.3 MiB on v7x (64 MiB VMEM).
    vmem_cap = _vmem_capacity_bytes()
    tile_target = min(8 * 1024 * 1024, vmem_cap // 12)
    if max_tile_bytes is not None:
        tile_target = min(tile_target, int(max_tile_bytes))

    w_bytes = 2 * C * Cr * w1.dtype.itemsize
    slab_bytes = C * HW * itemsize       # one flattened batch element

    cost = pl.CostEstimate(
        flops=int(2 * B * C * HW + 6 * B * C * Cr),
        transcendentals=int(B * C),
        bytes_accessed=int(B * C * HW * itemsize + w_bytes + B * C * itemsize),
    )

    def _vmem_limit(x_step_bytes, scratch_bytes):
        needed = 4 * x_step_bytes + 2 * w_bytes + scratch_bytes + (4 << 20)
        hard_cap = max(16 << 20, int(vmem_cap * 0.55))
        return int(min(max(needed, 16 << 20), hard_cap))

    if slab_bytes <= tile_target:
        # ---- Regime 1: fused, batch-tiled single pass ------------------------
        bt = 1
        for cand in range(1, B + 1):     # largest divisor of B that fits the target
            if B % cand == 0 and cand * slab_bytes <= tile_target:
                bt = cand
        kernel = functools.partial(_ca_fused_kernel, hw_total=HW)
        out = pl.pallas_call(
            kernel,
            out_shape=jax.ShapeDtypeStruct((B, 1, C), x.dtype),
            grid_spec=pltpu.PrefetchScalarGridSpec(
                num_scalar_prefetch=0,
                grid=(B // bt,),
                in_specs=[
                    pl.BlockSpec((bt, C, HW), lambda b: (b, 0, 0)),
                    pl.BlockSpec((C, Cr), lambda b: (0, 0)),
                    pl.BlockSpec((Cr, C), lambda b: (0, 0)),
                ],
                out_specs=pl.BlockSpec((bt, 1, C), lambda b: (b, 0, 0)),
            ),
            compiler_params=pltpu.CompilerParams(
                dimension_semantics=("parallel",),
                vmem_limit_bytes=_vmem_limit(bt * slab_bytes, 0),
            ),
            cost_estimate=cost,
        )(x_flat, w1t, w2t)
    else:
        # ---- Regime 2: streaming over spatial tiles --------------------------
        hw_tile = int(max(128, ((tile_target // (C * itemsize)) // 128) * 128))
        n_k = pl.cdiv(HW, hw_tile)
        needs_mask = (HW % hw_tile) != 0
        kernel = functools.partial(
            _ca_streaming_kernel, hw_total=HW, hw_tile=hw_tile,
            needs_mask=needs_mask)
        scratch_bytes = C * 128 * (4 + itemsize)
        out = pl.pallas_call(
            kernel,
            out_shape=jax.ShapeDtypeStruct((B, 1, C), x.dtype),
            grid_spec=pltpu.PrefetchScalarGridSpec(
                num_scalar_prefetch=0,
                grid=(B, n_k),
                in_specs=[
                    pl.BlockSpec((1, C, hw_tile), lambda b, k: (b, 0, k)),
                    pl.BlockSpec((C, Cr), lambda b, k: (0, 0)),
                    pl.BlockSpec((Cr, C), lambda b, k: (0, 0)),
                ],
                out_specs=pl.BlockSpec((1, 1, C), lambda b, k: (b, 0, 0)),
                scratch_shapes=[
                    pltpu.VMEM((1, C, 128), jnp.float32),   # lane-resident sum
                    pltpu.VMEM((1, C, 128), x.dtype),       # lane-resident max
                ],
            ),
            compiler_params=pltpu.CompilerParams(
                dimension_semantics=("parallel", "arbitrary"),
                vmem_limit_bytes=_vmem_limit(C * hw_tile * itemsize, scratch_bytes),
            ),
            cost_estimate=cost,
        )(x_flat, w1t, w2t)

    return out.reshape(B, C, 1, 1)


def _reference(x, w1, w2):
    # Pure-JAX reference matching the PyTorch forward.
    avg = jnp.mean(x, axis=(2, 3))          # (B, C)
    mx = jnp.max(x, axis=(2, 3))            # (B, C)

    def mlp(v):
        h = jnp.maximum(v @ w1.T, 0.0)
        return h @ w2.T

    return jnp.tanh(mlp(avg) + mlp(mx)).reshape(x.shape[0], x.shape[1], 1, 1)


if __name__ == "__main__":
    key = jax.random.PRNGKey(0)
    B, C, H, W = 2, 64, 16, 16              # in_planes=64 -> hidden = 64 // 16 = 4
    Cr = C // 16

    kx, k1, k2, k3 = jax.random.split(key, 4)
    x = jax.random.normal(kx, (B, C, H, W), dtype=jnp.float32)
    # Deterministic stand-ins for Conv2d kaiming-uniform init (1x1 kernels squeezed).
    w1 = jax.random.uniform(k1, (Cr, C), dtype=jnp.float32,
                            minval=-(1.0 / C) ** 0.5, maxval=(1.0 / C) ** 0.5)
    w2 = jax.random.uniform(k2, (C, Cr), dtype=jnp.float32,
                            minval=-(1.0 / Cr) ** 0.5, maxval=(1.0 / Cr) ** 0.5)

    ref = _reference(x, w1, w2)

    # 1) Fused single-step path (typical SE shapes), batch-tiled.
    out = channel_attention(x, w1, w2)
    jax.block_until_ready(out)
    assert out.shape == (B, C, 1, 1)
    assert jnp.allclose(out, ref, atol=1e-5, rtol=1e-5)

    # 2) Streaming path with exact tiling (forced 128-lane tiles, no mask).
    out_s = channel_attention(x, w1, w2, max_tile_bytes=C * 128 * 4)
    jax.block_until_ready(out_s)
    assert jnp.allclose(out_s, ref, atol=1e-5, rtol=1e-5)

    # 3) Streaming path with a masked final tile (HW=169 not a multiple of 128).
    x2 = jax.random.normal(k3, (B, C, 13, 13), dtype=jnp.float32)
    out2 = channel_attention(x2, w1, w2, max_tile_bytes=C * 128 * 4)
    jax.block_until_ready(out2)
    assert jnp.allclose(out2, _reference(x2, w1, w2), atol=1e-5, rtol=1e-5)

    print("KERNEL_OK")
</pallas_src>

<mosaic_0001>
module attributes {stable_mosaic.version = 11 : i64} {
  func.func @_ca_fused_kernel(%arg0: i32, %arg1: memref<2x64x256xf32, #tpu.memory_space<vmem>>, %arg2: memref<64x4xf32, #tpu.memory_space<vmem>>, %arg3: memref<4x64xf32, #tpu.memory_space<vmem>>, %arg4: memref<2x1x64xf32, #tpu.memory_space<vmem>>) attributes {dimension_semantics = [#tpu.dimension_semantics<parallel>], iteration_bounds = array<i64: 1>, scalar_prefetch = 0 : i64, scratch_operands = 0 : i64, tpu.core_type = #tpu.core_type<tc>, window_params = [{transform_indices = @transform_0, window_bounds = array<i64: 2, 64, 256>}, {pipeline_mode = #tpu.pipeline_mode<synchronous>, transform_indices = @transform_1, window_bounds = array<i64: 64, 4>}, {pipeline_mode = #tpu.pipeline_mode<synchronous>, transform_indices = @transform_2, window_bounds = array<i64: 4, 64>}, {transform_indices = @transform_3, window_bounds = array<i64: 2, 1, 64>}]} {
    %c0 = arith.constant 0 : index
    %c0_0 = arith.constant 0 : index
    %c0_1 = arith.constant 0 : index
    %0 = vector.load %arg1[%c0, %c0_0, %c0_1] : memref<2x64x256xf32, #tpu.memory_space<vmem>>, vector<2x64x256xf32>
    %cst = arith.constant dense<0.000000e+00> : vector<2x64xf32>
    %1 = vector.multi_reduction <add>, %0, %cst [2] : vector<2x64x256xf32> to vector<2x64xf32>
    %cst_2 = arith.constant 3.906250e-03 : f32
    %2 = vector.broadcast %cst_2 : f32 to vector<2x64xf32>
    %3 = arith.mulf %1, %2 : vector<2x64xf32>
    %cst_3 = arith.constant dense<0xFF800000> : vector<2x64xf32>
    %4 = vector.multi_reduction <maximumf>, %0, %cst_3 [2] : vector<2x64x256xf32> to vector<2x64xf32>
    %c0_4 = arith.constant 0 : index
    %c0_5 = arith.constant 0 : index
    %5 = vector.load %arg2[%c0_4, %c0_5] : memref<64x4xf32, #tpu.memory_space<vmem>>, vector<64x4xf32>
    %c0_6 = arith.constant 0 : index
    %c0_7 = arith.constant 0 : index
    %6 = vector.load %arg3[%c0_6, %c0_7] : memref<4x64xf32, #tpu.memory_space<vmem>>, vector<4x64xf32>
    %7 = tpu.concatenate %3, %4 in 0 : vector<2x64xf32>, vector<2x64xf32> -> vector<4x64xf32>
    %cst_8 = arith.constant dense<0.000000e+00> : vector<4x4xf32>
    %8 = tpu.matmul %7, %5, %cst_8 {dimension_numbers = #tpu.dot_dimension_numbers<[1], [0], [0], [1], [0, 0, 1, 1], [], []>} : vector<4x64xf32>, vector<64x4xf32>, vector<4x4xf32> -> vector<4x4xf32>
    %cst_9 = arith.constant 0.000000e+00 : f32
    %9 = vector.broadcast %cst_9 : f32 to vector<4x4xf32>
    %10 = arith.maximumf %8, %9 : vector<4x4xf32>
    %11 = vector.extract_strided_slice %10 {offsets = [0, 0], sizes = [2, 4], strides = [1, 1]} : vector<4x4xf32> to vector<2x4xf32>
    %12 = vector.extract_strided_slice %10 {offsets = [2, 0], sizes = [2, 4], strides = [1, 1]} : vector<4x4xf32> to vector<2x4xf32>
    %13 = arith.addf %11, %12 : vector<2x4xf32>
    %cst_10 = arith.constant dense<0.000000e+00> : vector<2x64xf32>
    %14 = tpu.matmul %13, %6, %cst_10 {dimension_numbers = #tpu.dot_dimension_numbers<[1], [0], [0], [1], [0, 0, 1, 1], [], []>} : vector<2x4xf32>, vector<4x64xf32>, vector<2x64xf32> -> vector<2x64xf32>
    %15 = math.tanh %14 : vector<2x64xf32>
    %16 = vector.shape_cast %15 : vector<2x64xf32> to vector<2x1x64xf32>
    %c0_11 = arith.constant 0 : index
    %c0_12 = arith.constant 0 : index
    %c0_13 = arith.constant 0 : index
    %17 = vector.load %arg4[%c0_11, %c0_12, %c0_13] : memref<2x1x64xf32, #tpu.memory_space<vmem>>, vector<2x1x64xf32>
    tpu.vector_store %arg4[%c0_11, %c0_12, %c0_13], %16 {strides = array<i32>} : memref<2x1x64xf32, #tpu.memory_space<vmem>>, vector<2x1x64xf32>,
    return
  }
  func.func @transform_0(%arg0: i32) -> (i32, i32, i32) {
    %c0_i32 = arith.constant 0 : i32
    %c0_i32_0 = arith.constant 0 : i32
    %c0_i32_1 = arith.constant 0 : i32
    return %arg0, %c0_i32, %c0_i32_0 : i32, i32, i32
  }
  func.func @transform_1(%arg0: i32) -> (i32, i32) {
    %c0_i32 = arith.constant 0 : i32
    %c0_i32_0 = arith.constant 0 : i32
    %c0_i32_1 = arith.constant 0 : i32
    return %c0_i32, %c0_i32_0 : i32, i32
  }
  func.func @transform_2(%arg0: i32) -> (i32, i32) {
    %c0_i32 = arith.constant 0 : i32
    %c0_i32_0 = arith.constant 0 : i32
    %c0_i32_1 = arith.constant 0 : i32
    return %c0_i32, %c0_i32_0 : i32, i32
  }
  func.func @transform_3(%arg0: i32) -> (i32, i32, i32) {
    %c0_i32 = arith.constant 0 : i32
    %c0_i32_0 = arith.constant 0 : i32
    %c0_i32_1 = arith.constant 0 : i32
    return %arg0, %c0_i32, %c0_i32_0 : i32, i32, i32
  }
}

</mosaic_0001>

<bundles_post_ra>
// kernel: tpu_custom_call.1
= control target key start
LH: loop header
LB: loop body
LE: loop exit
PB: predicated region body
PF: predicated region fallthrough
CT: control target
= control target key end

     0   :  { %8 = vsyncpa [#allocation3], 0  ;;  %s622_s0 = inlined_call_operand.hbm [shape: f32[2,64,256], index: 0, kind: input, shape index: {}]   ;;  %s623_s1 = inlined_call_operand.vmem [shape: f32[64,4], index: 1, kind: input, shape index: {}]   ;;  %s624_s2 = inlined_call_operand.vmem [shape: f32[4,64], index: 2, kind: input, shape index: {}]   ;;  %s625_s3 = inlined_call_operand.hbm [shape: f32[2,1,64], index: 3, kind: output, shape index: {}]  }
   0x1   :  { %9 = vsyncpa [#allocation4], 0  ;;  %s14_s14 = sshll.u32 %s622_s0, 4  ;;  %s445_s15 = smov [#allocation2]   ;;  %s15_s14 = int_to_ptr.hbm [resolvable:$true] %s14_s14 }
   0x2   :  { %s16_s16 = sshll.u32 %s445_s15, 4  ;;  %s446_s17 = smov 256   ;;  %s17_s16 = int_to_ptr.vmem [resolvable:$true] %s16_s16 }
   0x3   :  { %s447_s18 = smov 16  }
   0x4   :  { %22 = dma.hbm_to_vmem [thread:$0]  %s15_s14, 4096, %s17_s16, [#allocation3], %s446_s17, %s446_s17, %s447_s18  }
   0x5   :  { %441 = dma.done.wait [#allocation3], 4096  }
   0x6   :  { %442 = vsyncadd [#allocation3], 4294963200  ;;  %v47_v0 = vld [vmem:[#allocation2 + $0x80] sm:$0xff]  ;;  %v48_v1 = vld [vmem:[#allocation2 + $0x88] sm:$0xff]  ;;  %vm205_vm0 = vcmask 130112   ;;  %vm209_vm1 = vcmask 195712  }
   0x7   :  { %v35_v2 = vld [vmem:[#allocation2 + $0x20] sm:$0xff]  ;;  %v87_v3 = vadd.f32 %v48_v1, %v47_v0  ;;  %v36_v4 = vld [vmem:[#allocation2 + $0x28] sm:$0xff]  ;;  %v49_v9 = vld [vmem:[#allocation2 + $0x90] sm:$0xff]  ;;  %v151_v25 = vmax.f32 %v47_v0, %v48_v1  ;;  %v200_v1 = vlaneseq  ;;  %vm213_vm2 = vcmask 261312   ;;  %s448_s8 = smov [#allocation5]   ;;  %s370_s12 = sshll.u32 %s625_s3, 4  ;;  %s371_s12 = int_to_ptr.hbm [resolvable:$true] %s370_s12 }
   0x8   :  { %v31_v5 = vld [vmem:[#allocation2] sm:$0xff]  ;;  %v32_v6 = vld [vmem:[#allocation2 + $0x8] sm:$0xff]  ;;  %v69_v7 = vadd.f32 %v36_v4, %v35_v2  ;;  %v50_v10 = vld [vmem:[#allocation2 + $0x98] sm:$0xff]  ;;  %v133_v33 = vmax.f32 %v35_v2, %v36_v4  ;;  %vm217_vm3 = vcmask 326912   ;;  %vm221_vm4 = vcmask 392512   ;;  %s368_s9 = sshll.u32 %s448_s8, 4  ;;  %s369_s9 = int_to_ptr.vmem [resolvable:$true] %s368_s9 }
   0x9   :  { %v63_v8 = vadd.f32 %v32_v6, %v31_v5  ;;  %88 = vadd.xlane.f32.xlu1 %v87_v3  ;;  %v51_v11 = vld [vmem:[#allocation2 + $0xa0] sm:$0xff]  ;;  %v52_v12 = vld [vmem:[#allocation2 + $0xa8] sm:$0xff]  ;;  %v33_v13 = vld [vmem:[#allocation2 + $0x10] sm:$0xff]  ;;  %v90_v15 = vadd.f32 %v50_v10, %v49_v9  ;;  %v127_v23 = vmax.f32 %v31_v5, %v32_v6  ;;  %v154_v26 = vmax.f32 %v49_v9, %v50_v10 }
   0xa   :  { %70 = vadd.xlane.f32.xlu2 %v69_v7  ;;  %v34_v14 = vld [vmem:[#allocation2 + $0x18] sm:$0xff]  ;;  %v93_v16 = vadd.f32 %v52_v12, %v51_v11  ;;  %v53_v18 = vld [vmem:[#allocation2 + $0xb0] sm:$0xff]  ;;  %v55_v28 = vld [vmem:[#allocation2 + $0xc0] sm:$0xff]  ;;  %v157_v41 = vmax.f32 %v51_v11, %v52_v12  ;;  %v474_v4 = vand.u32 127, %v200_v1  ;;  %vm225_vm5 = vcmask 458112  }
   0xb   :  { %64 = vadd.xlane.f32.xlu0 %v63_v8  ;;  %v66_v17 = vadd.f32 %v34_v14, %v33_v13  ;;  %v54_v19 = vld [vmem:[#allocation2 + $0xb8] sm:$0xff]  ;;  %v37_v20 = vld [vmem:[#allocation2 + $0x30] sm:$0xff]  ;;  %v130_v27 = vmax.f32 %v33_v13, %v34_v14  ;;  %v56_v29 = vld [vmem:[#allocation2 + $0xc8] sm:$0xff]  ;;  %vm229_vm6 = vcmask 523712   ;;  %vm246_vm7 = vcmask 1041409  }
   0xc   :  { %v38_v21 = vld [vmem:[#allocation2 + $0x38] sm:$0xff]  ;;  %v96_v22 = vadd.f32 %v54_v19, %v53_v18  ;;  %v39_v30 = vld [vmem:[#allocation2 + $0x40] sm:$0xff]  ;;  %v40_v31 = vld [vmem:[#allocation2 + $0x48] sm:$0xff]  ;;  %v99_v32 = vadd.f32 %v56_v29, %v55_v28  ;;  %v160_v44 = vmax.f32 %v53_v18, %v54_v19  ;;  %v163_v50 = vmax.f32 %v55_v28, %v56_v29 }
   0xd   :  { %v72_v24 = vadd.f32 %v38_v21, %v37_v20  ;;  %v75_v34 = vadd.f32 %v40_v31, %v39_v30  ;;  %v41_v35 = vld [vmem:[#allocation2 + $0x50] sm:$0xff]  ;;  %v42_v36 = vld [vmem:[#allocation2 + $0x58] sm:$0xff]  ;;  %v43_v42 = vld [vmem:[#allocation2 + $0x60] sm:$0xff]  ;;  %v136_v46 = vmax.f32 %v37_v20, %v38_v21  ;;  %v139_v49 = vmax.f32 %v39_v30, %v40_v31 }
   0xe   :  { %v57_v37 = vld [vmem:[#allocation2 + $0xd0] sm:$0xff]  ;;  %v58_v38 = vld [vmem:[#allocation2 + $0xd8] sm:$0xff]  ;;  %v78_v39 = vadd.f32 %v42_v36, %v41_v35  ;;  %v44_v43 = vld [vmem:[#allocation2 + $0x68] sm:$0xff]  ;;  %v142_v57 = vmax.f32 %v41_v35, %v42_v36  ;;  %v477_v6 = vadd.s32 4294967288, %v474_v4  ;;  %v480_v9 = vadd.s32 4294967280, %v474_v4 }
   0xf   :  { %v102_v40 = vadd.f32 %v58_v38, %v57_v37  ;;  %v81_v45 = vadd.f32 %v44_v43, %v43_v42  ;;  %v59_v47 = vld [vmem:[#allocation2 + $0xe0] sm:$0xff]  ;;  %v60_v48 = vld [vmem:[#allocation2 + $0xe8] sm:$0xff]  ;;  %v61_v52 = vld [vmem:[#allocation2 + $0xf0] sm:$0xff]  ;;  %v145_v59 = vmax.f32 %v43_v42, %v44_v43  ;;  %v166_v60 = vmax.f32 %v57_v37, %v58_v38 }
  0x10   :  { %v105_v51 = vadd.f32 %v60_v48, %v59_v47  ;;  %v62_v53 = vld [vmem:[#allocation2 + $0xf8] sm:$0xff]  ;;  %v45_v54 = vld [vmem:[#allocation2 + $0x70] sm:$0xff]  ;;  %v169_v61 = vmax.f32 %v59_v47, %v60_v48  ;;  %v180_v37 = vld [vmem:[%s623_s1 + $0x28] sm:$0xff]  ;;  %v535_v48 = vadd.s32 4294967272, %v474_v4  ;;  %vm295_vm8 = vcmask 1043459  }
  0x11   :  { %91 = vadd.xlane.f32.xlu1 %v90_v15  ;;  %v46_v55 = vld [vmem:[#allocation2 + $0x78] sm:$0xff]  ;;  %v108_v56 = vadd.f32 %v62_v53, %v61_v52  ;;  %v172_v62 = vmax.f32 %v61_v52, %v62_v53  ;;  %v181_v36 = vld [vmem:[%s623_s1 + $0x30] sm:$0xff]  ;;  %v179_v38 = vld [vmem:[%s623_s1 + $0x20] sm:$0xff]  ;;  %v540_v53 = vadd.s32 4294967264, %v474_v4  ;;  %vm298_vm9 = vcmask 1041408  }
  0x12   :  { %94 = vadd.xlane.f32.xlu2 %v93_v16  ;;  %v84_v58 = vadd.f32 %v46_v55, %v45_v54  ;;  %v148_v63 = vmax.f32 %v45_v54, %v46_v55  ;;  %v177_v43 = vld [vmem:[%s623_s1 + $0x10] sm:$0xff]  ;;  %vm300_vm10 = vcmask 523264   ;;  %vm333_vm11 = vcmask 1043456  }
  0x13   :  { %67 = vadd.xlane.f32.xlu0 %v66_v17  ;;  %vm329_vm12 = vcmask 31744   ;;  %vm361_vm13 = vcmask 516096  }
  0x19   :  { %97 = vadd.xlane.f32.xlu1 %v96_v22 }
  0x1a   :  { %128 = vmax.xlane.f32.xlu2 %v127_v23 }
  0x1b   :  { %73 = vadd.xlane.f32.xlu0 %v72_v24 }
  0x21   :  { %152 = vmax.xlane.f32.xlu1 %v151_v25 }
  0x22   :  { %155 = vmax.xlane.f32.xlu2 %v154_v26 }
  0x23   :  { %131 = vmax.xlane.f32.xlu0 %v130_v27 }
  0x29   :  { %100 = vadd.xlane.f32.xlu1 %v99_v32  ;;  %v182_v32 = vld [vmem:[%s623_s1 + $0x38] sm:$0xff] }
  0x2a   :  { %134 = vmax.xlane.f32.xlu2 %v133_v33  ;;  %312 = vmatpush.msra.mxu0 %v182_v32 }
  0x2b   :  { %76 = vadd.xlane.f32.xlu0 %v75_v34 }
  0x2c   :  { %313 = vmatpush.msra.mxu0 %v181_v36 }
  0x2e   :  { %314 = vmatpush.msra.mxu0 %v180_v37 }
  0x30   :  { %315 = vmatpush.msra.mxu0 %v179_v38 }
  0x31   :  { %79 = vadd.xlane.f32.xlu1 %v78_v39  ;;  %v178_v39 = vld [vmem:[%s623_s1 + $0x18] sm:$0xff] }
  0x32   :  { %103 = vadd.xlane.f32.xlu2 %v102_v40  ;;  %316 = vmatpush.msra.mxu0 %v178_v39 }
  0x33   :  { %158 = vmax.xlane.f32.xlu0 %v157_v41 }
  0x34   :  { %317 = vmatpush.msra.mxu0 %v177_v43 }
  0x39   :  { %161 = vmax.xlane.f32.xlu1 %v160_v44  ;;  %v176_v44 = vld [vmem:[%s623_s1 + $0x8] sm:$0xff] }
  0x3a   :  { %82 = vadd.xlane.f32.xlu2 %v81_v45  ;;  %318 = vmatpush.msra.mxu0 %v176_v44  ;;  %v175_v45 = vld [vmem:[%s623_s1] sm:$0xff] }
  0x3b   :  { %137 = vmax.xlane.f32.xlu0 %v136_v46 }
  0x3c   :  { %319 = vmatpush.msra.mxu0 %v175_v45 }
  0x41   :  { %140 = vmax.xlane.f32.xlu1 %v139_v49 }
  0x42   :  { %164 = vmax.xlane.f32.xlu2 %v163_v50 }
  0x43   :  { %106 = vadd.xlane.f32.xlu0 %v105_v51 }
  0x49   :  { %109 = vadd.xlane.f32.xlu1 %v108_v56  ;;  %v543_v56 = vadd.s32 4294967256, %v474_v4 }
  0x4a   :  { %143 = vmax.xlane.f32.xlu2 %v142_v57 }
  0x4b   :  { %85 = vadd.xlane.f32.xlu0 %v84_v58 }
  0x51   :  { %146 = vmax.xlane.f32.xlu1 %v145_v59 }
  0x52   :  { %170 = vmax.xlane.f32.xlu2 %v169_v61 }
  0x53   :  { %167 = vmax.xlane.f32.xlu0 %v166_v60 }
  0x59   :  { %173 = vmax.xlane.f32.xlu1 %v172_v62  ;;  %v548_v62 = vadd.s32 4294967248, %v474_v4 }
  0x5b   :  { %149 = vmax.xlane.f32.xlu0 %v148_v63 }
  0x7c   :  { %v89_v0 = vpop.xlane.xlu1 %88 }
  0x7d   :  { %v71_v2 = vpop.xlane.xlu2 %70  ;;  %v119_v5 = vmul.f32 0.00390625, %v89_v0 }
  0x7e   :  { %v65_v3 = vpop.xlane.xlu0 %64  ;;  %v113_v10 = vmul.f32 0.00390625, %v71_v2 }
  0x7f   :  { %v111_v7 = vmul.f32 0.00390625, %v65_v3  ;;  %v231_v15 = vperm.slane %v119_v5, %v474_v4  ;;  %v555_v5 = vadd.s32 4294967240, %v474_v4 }
  0x80   :  { %v208_v19 = vperm.slane %v113_v10, %v480_v9 }
  0x81   :  { %v202_v17 = vperm.slane %v111_v7, %v474_v4 }
  0x84   :  { %v92_v8 = vpop.xlane.xlu1 %91 }
  0x85   :  { %v120_v11 = vmul.f32 0.00390625, %v92_v8  ;;  %v95_v12 = vpop.xlane.xlu2 %94 }
  0x86   :  { %v68_v13 = vpop.xlane.xlu0 %67  ;;  %v121_v46 = vmul.f32 0.00390625, %v95_v12 }
  0x87   :  { %v112_v14 = vmul.f32 0.00390625, %v68_v13  ;;  %v232_v16 = vperm.slane %v120_v11, %v477_v6 }
  0x88   :  { %v234_v58 = vperm.slane %v121_v46, %v480_v9 }
  0x89   :  { %v204_v18 = vperm.slane %v112_v14, %v477_v6  ;;  %v233_v20 = vsel %vm205_vm0, %v232_v16, %v231_v15 }
  0x8a   :  { %v235_v7 = vsel %vm209_vm1, %v234_v58, %v233_v20 }
  0x8b   :  { %v206_v21 = vsel %vm205_vm0, %v204_v18, %v202_v17 }
  0x8c   :  { %v490_v22 = vsel %vm209_vm1, %v208_v19, %v206_v21  ;;  %v98_v23 = vpop.xlane.xlu1 %97 }
  0x8d   :  { %v492_v24 = vpop.xlane.xlu2 %128  ;;  %v122_v49 = vmul.f32 0.00390625, %v98_v23 }
  0x8e   :  { %v74_v25 = vpop.xlane.xlu0 %73  ;;  %v265_v44 = vperm.slane %v492_v24, %v474_v4 }
  0x8f   :  { %v114_v52 = vmul.f32 0.00390625, %v74_v25  ;;  %v236_v61 = vperm.slane %v122_v49, %v535_v48 }
  0x91   :  { %v212_v0 = vperm.slane %v114_v52, %v535_v48  ;;  %v237_v12 = vsel %vm213_vm2, %v236_v61, %v235_v7 }
  0x93   :  { %v214_v17 = vsel %vm213_vm2, %v212_v0, %v490_v22  ;;  %v183_v0 = vld [vmem:[%s624_s2] sm:$0xf]  ;;  %s449_s2 = smov 1  }
  0x94   :  { %v494_v26 = vpop.xlane.xlu1 %152  ;;  %384 = vmatpush.msk.msra.mxu1 %vm333_vm11, %v183_v0 }
  0x95   :  { %v496_v27 = vpop.xlane.xlu2 %155 }
  0x96   :  { %v498_v28 = vpop.xlane.xlu0 %131  ;;  %v281_v36 = vperm.slane %v496_v27, %v477_v6 }
  0x97   :  { %v266_v45 = vperm.slane %v498_v28, %v477_v6 }
  0x99   :  { %v267_v24 = vsel %vm205_vm0, %v266_v45, %v265_v44 }
  0x9c   :  { %v101_v29 = vpop.xlane.xlu1 %100 }
  0x9d   :  { %v500_v30 = vpop.xlane.xlu2 %134  ;;  %v123_v54 = vmul.f32 0.00390625, %v101_v29 }
  0x9e   :  { %v77_v31 = vpop.xlane.xlu0 %76  ;;  %v268_v46 = vperm.slane %v500_v30, %v480_v9 }
  0x9f   :  { %v115_v55 = vmul.f32 0.00390625, %v77_v31  ;;  %v238_v1 = vperm.slane %v123_v54, %v540_v53 }
  0xa0   :  { %v269_v30 = vsel %vm209_vm1, %v268_v46, %v267_v24 }
  0xa1   :  { %v216_v2 = vperm.slane %v115_v55, %v540_v53  ;;  %v239_v18 = vsel %vm217_vm3, %v238_v1, %v237_v12 }
  0xa3   :  { %v218_v20 = vsel %vm217_vm3, %v216_v2, %v214_v17 }
  0xa4   :  { %v80_v33 = vpop.xlane.xlu1 %79 }
  0xa5   :  { %v104_v34 = vpop.xlane.xlu2 %103  ;;  %v116_v59 = vmul.f32 0.00390625, %v80_v33 }
  0xa6   :  { %v505_v35 = vpop.xlane.xlu0 %158  ;;  %v124_v57 = vmul.f32 0.00390625, %v104_v34  ;;  %v280_v34 = vperm.slane %v494_v26, %v474_v4 }
  0xa7   :  { %v220_v8 = vperm.slane %v116_v59, %v543_v56  ;;  %v283_v38 = vperm.slane %v505_v35, %v480_v9 }
  0xa8   :  { %v240_v3 = vperm.slane %v124_v57, %v543_v56  ;;  %v282_v27 = vsel %vm205_vm0, %v281_v36, %v280_v34 }
  0xa9   :  { %v222_v25 = vsel %vm221_vm4, %v220_v8, %v218_v20 }
  0xaa   :  { %v241_v21 = vsel %vm221_vm4, %v240_v3, %v239_v18 }
  0xac   :  { %v519_v40 = vpop.xlane.xlu1 %161 }
  0xad   :  { %v83_v41 = vpop.xlane.xlu2 %82 }
  0xae   :  { %v521_v42 = vpop.xlane.xlu0 %137  ;;  %v117_v63 = vmul.f32 0.00390625, %v83_v41  ;;  %v285_v41 = vperm.slane %v519_v40, %v535_v48  ;;  %v284_v40 = vsel %vm209_vm1, %v283_v38, %v282_v27 }
  0xb0   :  { %v224_v13 = vperm.slane %v117_v63, %v548_v62  ;;  %v286_v4 = vsel %vm213_vm2, %v285_v41, %v284_v40 }
  0xb2   :  { %v226_v32 = vsel %vm225_vm5, %v224_v13, %v222_v25 }
  0xb4   :  { %v532_v47 = vpop.xlane.xlu1 %140 }
  0xb5   :  { %v537_v50 = vpop.xlane.xlu2 %164  ;;  %v272_v6 = vperm.slane %v532_v47, %v540_v53 }
  0xb6   :  { %v107_v51 = vpop.xlane.xlu0 %106  ;;  %v287_v26 = vperm.slane %v537_v50, %v540_v53 }
  0xb7   :  { %v125_v60 = vmul.f32 0.00390625, %v107_v51  ;;  %v270_v51 = vperm.slane %v521_v42, %v535_v48 }
  0xb8   :  { %v288_v28 = vsel %vm217_vm3, %v287_v26, %v286_v4 }
  0xb9   :  { %v242_v10 = vperm.slane %v125_v60, %v548_v62  ;;  %v271_v42 = vsel %vm213_vm2, %v270_v51, %v269_v30 }
  0xba   :  { %v273_v55 = vsel %vm217_vm3, %v272_v6, %v271_v42 }
  0xbb   :  { %v243_v29 = vsel %vm225_vm5, %v242_v10, %v241_v21 }
  0xbc   :  { %v110_v11 = vpop.xlane.xlu1 %109 }
  0xbd   :  { %v126_v14 = vmul.f32 0.00390625, %v110_v11  ;;  %v144_v15 = vpop.xlane.xlu2 %143 }
  0xbe   :  { %v86_v16 = vpop.xlane.xlu0 %85  ;;  %v274_v50 = vperm.slane %v144_v15, %v543_v56 }
  0xbf   :  { %v118_v19 = vmul.f32 0.00390625, %v86_v16  ;;  %v244_v23 = vperm.slane %v126_v14, %v555_v5 }
  0xc0   :  { %v275_v57 = vsel %vm221_vm4, %v274_v50, %v273_v55 }
  0xc1   :  { %v228_v31 = vperm.slane %v118_v19, %v555_v5  ;;  %v245_v22 = vsel %vm229_vm6, %v244_v23, %v243_v29 }
  0xc3   :  { %v230_v33 = vsel %vm229_vm6, %v228_v31, %v226_v32 }
  0xc4   :  { %v247_v37 = vsel %vm246_vm7, %v245_v22, %v230_v33  ;;  %v147_v39 = vpop.xlane.xlu1 %146 }
  0xc5   :  { %v171_v49 = vpop.xlane.xlu2 %170  ;;  %v276_v52 = vperm.slane %v147_v39, %v548_v62 }
  0xc6   :  { %v168_v43 = vpop.xlane.xlu0 %167  ;;  %v291_v9 = vperm.slane %v171_v49, %v548_v62 }
  0xc7   :  { %v289_v35 = vperm.slane %v168_v43, %v543_v56  ;;  %v277_v59 = vsel %vm225_vm5, %v276_v52, %v275_v57 }
  0xc9   :  { %v290_v54 = vsel %vm221_vm4, %v289_v35, %v288_v28 }
  0xca   :  { %v292_v56 = vsel %vm225_vm5, %v291_v9, %v290_v54 }
  0xcc   :  { %v174_v48 = vpop.xlane.xlu1 %173 }
  0xcd   :  { %v293_v47 = vperm.slane %v174_v48, %v555_v5 }
  0xce   :  { %v150_v53 = vpop.xlane.xlu0 %149 }
  0xcf   :  { %v278_v58 = vperm.slane %v150_v53, %v555_v5  ;;  %v294_v60 = vsel %vm229_vm6, %v293_v47, %v292_v56 }
  0xd1   :  { %v279_v61 = vsel %vm229_vm6, %v278_v58, %v277_v59 }
  0xd2   :  { %v296_v62 = vsel %vm295_vm8, %v294_v60, %v279_v61 }
  0xd3   :  { %v299_v63 = vsel %vm298_vm9, %v247_v37, %v296_v62 }
  0xd4   :  { %383 = vmatmul.msk.f32.vlgmr.msra.gmra.mxu0 %vm300_vm10, %v299_v63 }
 0x151   :  { %v321_v1 = vpop.f32.mrf.mxu0 }
 0x152   :  { %v324_v2 = vmax.f32 %v321_v1, 0.0 }
 0x154   :  { %v326_v3 = vrot.slane %v324_v2, 2 }
 0x156   :  { %v328_v5 = vadd.f32 %v326_v3, %v324_v2 }
 0x158   :  { %385 = vmatmul.msk.f32.vlgmr.msra.gmra.mxu1 %vm329_vm12, %v328_v5 }
 0x1d5   :  { %v354_v7 = vpop.f32.mrf.mxu1 }
 0x1d6   :  { %391 = vtanh.f32 %v354_v7 }
 0x1dc   :  { %v392_v8 = vpop.eup %391 }
 0x1dd   :  { %v359_v10 = vrot.slane %v392_v8, 1  ;;  %362 = vst.msk [vmem:[#allocation5] sm:$0x1] %vm361_vm13, %v392_v8 }
 0x1df   :  { %363 = vst.msk [vmem:[#allocation5 + $0x1] sm:$0x1] %vm361_vm13, %v359_v10 }
 0x1e0   :  { %376 = dma.vmem_to_hbm [thread:$0]  %s369_s9, 32, %s371_s12, [#allocation4], %s447_s18, %s447_s18, %s449_s2  }
 0x1e1   :  { %443 = dma.done.wait [#allocation4], 32  }
 0x1e2   :  { %444 = vsyncadd [#allocation4], 4294967264 }
 0x1e3   :  { %381 = vsyncpa [#allocation3], 1 }
 0x1e4   :  { %382 = vsyncpa [#allocation4], 1 }

</bundles_post_ra>
